<compile_context>
chip_gen: v7x
topology: tpu7x:2x2x1
jax: 0.10.0
libtpu: 0.0.40
codegen_flags: <defaults>
</compile_context>

<pallas_src>
import functools

import jax
import jax.numpy as jnp
from jax.experimental import pallas as pl
from jax.experimental.pallas import tpu as pltpu


def _pick_row_tile(hw: int) -> int:
    """Largest row tile (multiple of 8, capped at 1024) that divides HW."""
    for tm in (1024, 512, 256, 128, 64, 32, 16, 8):
        if hw % tm == 0:
            return tm
    return hw  # tiny / odd spatial sizes: single block


def _fused_kernel(p_ref, wc_ref, bc_ref, scale_ref, shift_ref, wl_ref, bl_ref,
                  o_ref, pool_acc, *, inv_hw):
    """Conv(3x3 im2col matmul)+ReLU -> BN+ReLU -> avgpool(acc) -> Linear -> log_softmax."""
    t = pl.program_id(1)

    @pl.when(t == 0)
    def _():
        pool_acc[...] = jnp.zeros_like(pool_acc)

    # block: conv as a single MXU matmul over the 9*Cin patch columns (bf16 in, f32 acc).
    conv = jnp.dot(p_ref[0], wc_ref[...], preferred_element_type=jnp.float32)
    conv = jnp.maximum(conv + bc_ref[...], 0.0)                    # bias + ReLU
    # classifier: eval-mode BN folded into scale/shift on host, then ReLU.
    y = jnp.maximum(conv * scale_ref[...] + shift_ref[...], 0.0)
    # AdaptiveAvgPool2d(1): accumulate this tile's spatial sum for the image.
    pool_acc[...] += jnp.sum(y, axis=0, keepdims=True)

    @pl.when(t == pl.num_programs(1) - 1)
    def _():
        pooled = pool_acc[...] * inv_hw                            # (1, Cout)
        logits = jnp.dot(pooled, wl_ref[...],
                         preferred_element_type=jnp.float32) + bl_ref[...]
        m = jnp.max(logits, axis=-1, keepdims=True)
        z = logits - m
        lse = jnp.log(jnp.sum(jnp.exp(z), axis=-1, keepdims=True))
        o_ref[0] = z - lse                                         # log_softmax


def init_params(key, cin, cout, num_classes):
    ks = jax.random.split(key, 8)
    return {
        # block: Conv2d(Cin, Cout, 3, padding=1)
        "conv_w": 0.1 * jax.random.normal(ks[0], (cout, cin, 3, 3), jnp.float32),
        "conv_b": 0.1 * jax.random.normal(ks[1], (cout,), jnp.float32),
        # classifier.bn = BatchNorm2d(Cout) (eval-mode running stats)
        "bn_gamma": 1.0 + 0.1 * jax.random.normal(ks[2], (cout,), jnp.float32),
        "bn_beta": 0.1 * jax.random.normal(ks[3], (cout,), jnp.float32),
        "bn_mean": 0.1 * jax.random.normal(ks[4], (cout,), jnp.float32),
        "bn_var": 0.5 + jax.random.uniform(ks[5], (cout,), jnp.float32),
        # classifier.linear = Linear(Cout, num_classes)
        "lin_w": 0.1 * jax.random.normal(ks[6], (num_classes, cout), jnp.float32),
        "lin_b": 0.1 * jax.random.normal(ks[7], (num_classes,), jnp.float32),
    }


def weak_classifier_forward(x_nchw, params):
    N, Cin, H, W = x_nchw.shape
    Cout = params["conv_w"].shape[0]
    K = params["lin_w"].shape[0]
    HW = H * W
    eps = 1e-5

    # ---- glue: NCHW -> NHWC, 3x3 im2col (pad=1, stride=1), bf16 matmul operands ----
    x = jnp.transpose(x_nchw, (0, 2, 3, 1))                        # (N, H, W, Cin)
    xp = jnp.pad(x, ((0, 0), (1, 1), (1, 1), (0, 0)))
    taps = [xp[:, dy:dy + H, dx:dx + W, :] for dy in range(3) for dx in range(3)]
    patches = jnp.stack(taps, axis=3).reshape(N, HW, 9 * Cin)
    patches = patches.astype(jnp.bfloat16)

    # conv weight (Cout, Cin, 3, 3) -> (ky, kx, cin, cout) -> (9*Cin, Cout), bf16.
    wconv = jnp.transpose(params["conv_w"], (2, 3, 1, 0)).reshape(9 * Cin, Cout)
    wconv = wconv.astype(jnp.bfloat16)
    bconv = params["conv_b"].reshape(1, Cout).astype(jnp.float32)

    # BN (eval mode) folded on the host: y = x * scale + shift.
    scale = (params["bn_gamma"] *
             jax.lax.rsqrt(params["bn_var"] + eps)).reshape(1, Cout)
    shift = (params["bn_beta"].reshape(1, Cout) -
             params["bn_mean"].reshape(1, Cout) * scale)

    wlin = jnp.transpose(params["lin_w"]).astype(jnp.float32)      # (Cout, K)
    blin = params["lin_b"].reshape(1, K).astype(jnp.float32)

    TM = _pick_row_tile(HW)
    n_tiles = HW // TM

    # VMEM budget: double-buffered bf16 patches tile + params/scratch headroom.
    # Capped at 32 MiB so it also fits v7x's smaller (64 MiB) VMEM.
    tile_bytes = TM * 9 * Cin * 2
    vmem_limit = int(min(32 * 2**20, max(4 * 2**20, 8 * tile_bytes)))

    kernel = functools.partial(_fused_kernel, inv_hw=1.0 / float(HW))

    out = pl.pallas_call(
        kernel,
        out_shape=jax.ShapeDtypeStruct((N, 1, K), jnp.float32),
        grid=(N, n_tiles),
        in_specs=[
            pl.BlockSpec((1, TM, 9 * Cin), lambda n, t: (n, t, 0)),   # patches tile
            pl.BlockSpec((9 * Cin, Cout), lambda n, t: (0, 0)),       # conv weight
            pl.BlockSpec((1, Cout), lambda n, t: (0, 0)),             # conv bias
            pl.BlockSpec((1, Cout), lambda n, t: (0, 0)),             # BN scale
            pl.BlockSpec((1, Cout), lambda n, t: (0, 0)),             # BN shift
            pl.BlockSpec((Cout, K), lambda n, t: (0, 0)),             # linear W^T
            pl.BlockSpec((1, K), lambda n, t: (0, 0)),                # linear bias
        ],
        out_specs=pl.BlockSpec((1, 1, K), lambda n, t: (n, 0, 0)),
        scratch_shapes=[pltpu.VMEM((1, Cout), jnp.float32)],          # pooled-sum acc
        compiler_params=pltpu.CompilerParams(
            dimension_semantics=("parallel", "arbitrary"),
            vmem_limit_bytes=vmem_limit,
        ),
    )(patches, wconv, bconv, scale, shift, wlin, blin)

    return out.reshape(N, K)


def _reference_forward(x_nchw, params):
    """Pure-JAX f32 reference (eval-mode BN), for correctness checking."""
    eps = 1e-5
    x = jnp.transpose(x_nchw, (0, 2, 3, 1))                        # NHWC
    kern = jnp.transpose(params["conv_w"], (2, 3, 1, 0))           # HWIO
    conv = jax.lax.conv_general_dilated(
        x, kern, window_strides=(1, 1), padding="SAME",
        dimension_numbers=("NHWC", "HWIO", "NHWC"))
    feat = jnp.maximum(conv + params["conv_b"], 0.0)
    scale = params["bn_gamma"] / jnp.sqrt(params["bn_var"] + eps)
    shift = params["bn_beta"] - params["bn_mean"] * scale
    y = jnp.maximum(feat * scale + shift, 0.0)
    pooled = jnp.mean(y, axis=(1, 2))                              # (N, Cout)
    logits = pooled @ params["lin_w"].T + params["lin_b"]
    return jax.nn.log_softmax(logits, axis=-1)


if __name__ == "__main__":
    # Small shapes consistent with the module: NCHW input, 4 -> 8 channels, 10 classes.
    N, Cin, H, W = 2, 4, 16, 16
    Cout, num_classes = 8, 10

    key = jax.random.PRNGKey(0)
    kx, kp = jax.random.split(key)
    x = jax.random.normal(kx, (N, Cin, H, W), jnp.float32)
    params = init_params(kp, Cin, Cout, num_classes)

    out = weak_classifier_forward(x, params)
    jax.block_until_ready(out)

    assert out.shape == (N, num_classes)
    # log_softmax rows should (numerically) sum to 1 in prob space
    assert jnp.allclose(jnp.sum(jnp.exp(out), axis=-1), 1.0, atol=1e-4)
    # compare against a pure-JAX f32 reference (bf16 matmul inputs -> loose-ish tol)
    ref = _reference_forward(x, params)
    assert jnp.allclose(out, ref, atol=2e-2, rtol=0.0), \
        float(jnp.max(jnp.abs(out - ref)))
    print("KERNEL_OK")
</pallas_src>

<mosaic_0001>
module attributes {stable_mosaic.version = 11 : i64} {
  func.func @_fused_kernel(%arg0: i32, %arg1: i32, %arg2: memref<1x256x36xbf16, #tpu.memory_space<vmem>>, %arg3: memref<36x8xbf16, #tpu.memory_space<vmem>>, %arg4: memref<1x8xf32, #tpu.memory_space<vmem>>, %arg5: memref<1x8xf32, #tpu.memory_space<vmem>>, %arg6: memref<1x8xf32, #tpu.memory_space<vmem>>, %arg7: memref<8x10xf32, #tpu.memory_space<vmem>>, %arg8: memref<1x10xf32, #tpu.memory_space<vmem>>, %arg9: memref<1x1x10xf32, #tpu.memory_space<vmem>>, %arg10: memref<1x8xf32, #tpu.memory_space<vmem>>) attributes {dimension_semantics = [#tpu.dimension_semantics<parallel>, #tpu.dimension_semantics<arbitrary>], iteration_bounds = array<i64: 2, 1>, scalar_prefetch = 0 : i64, scratch_operands = 1 : i64, tpu.core_type = #tpu.core_type<tc>, window_params = [{transform_indices = @transform_0, window_bounds = array<i64: 1, 256, 36>}, {pipeline_mode = #tpu.pipeline_mode<synchronous>, transform_indices = @transform_1, window_bounds = array<i64: 36, 8>}, {pipeline_mode = #tpu.pipeline_mode<synchronous>, transform_indices = @transform_2, window_bounds = array<i64: 1, 8>}, {pipeline_mode = #tpu.pipeline_mode<synchronous>, transform_indices = @transform_3, window_bounds = array<i64: 1, 8>}, {pipeline_mode = #tpu.pipeline_mode<synchronous>, transform_indices = @transform_4, window_bounds = array<i64: 1, 8>}, {pipeline_mode = #tpu.pipeline_mode<synchronous>, transform_indices = @transform_5, window_bounds = array<i64: 8, 10>}, {pipeline_mode = #tpu.pipeline_mode<synchronous>, transform_indices = @transform_6, window_bounds = array<i64: 1, 10>}, {transform_indices = @transform_7, window_bounds = array<i64: 1, 1, 10>}]} {
    %c0_i32 = arith.constant 0 : i32
    %0 = arith.cmpi eq, %arg1, %c0_i32 : i32
    %1 = arith.extui %0 : i1 to i32
    %c0_i32_0 = arith.constant 0 : i32
    %2 = arith.cmpi ne, %1, %c0_i32_0 : i32
    scf.if %2 {
      %cst_20 = arith.constant 0.000000e+00 : f32
      %28 = vector.broadcast %cst_20 : f32 to vector<1x8xf32>
      %c0_21 = arith.constant 0 : index
      %c0_22 = arith.constant 0 : index
      %29 = vector.load %arg10[%c0_21, %c0_22] : memref<1x8xf32, #tpu.memory_space<vmem>>, vector<1x8xf32>
      tpu.vector_store %arg10[%c0_21, %c0_22], %28 {strides = array<i32>} : memref<1x8xf32, #tpu.memory_space<vmem>>, vector<1x8xf32>,
    } else {
    }
    %c0 = arith.constant 0 : index
    %c0_1 = arith.constant 0 : index
    %c0_2 = arith.constant 0 : index
    %3 = vector.load %arg2[%c0, %c0_1, %c0_2] : memref<1x256x36xbf16, #tpu.memory_space<vmem>>, vector<1x256x36xbf16>
    %4 = vector.shape_cast %3 : vector<1x256x36xbf16> to vector<256x36xbf16>
    %c0_3 = arith.constant 0 : index
    %c0_4 = arith.constant 0 : index
    %5 = vector.load %arg3[%c0_3, %c0_4] : memref<36x8xbf16, #tpu.memory_space<vmem>>, vector<36x8xbf16>
    %cst = arith.constant dense<0.000000e+00> : vector<256x8xf32>
    %6 = tpu.matmul %4, %5, %cst {dimension_numbers = #tpu.dot_dimension_numbers<[1], [0], [0], [1], [0, 0, 1, 1], [], []>} : vector<256x36xbf16>, vector<36x8xbf16>, vector<256x8xf32> -> vector<256x8xf32>
    %c0_5 = arith.constant 0 : index
    %c0_6 = arith.constant 0 : index
    %7 = vector.load %arg4[%c0_5, %c0_6] : memref<1x8xf32, #tpu.memory_space<vmem>>, vector<1x8xf32>
    %8 = vector.broadcast %7 : vector<1x8xf32> to vector<256x8xf32>
    %9 = arith.addf %6, %8 : vector<256x8xf32>
    %cst_7 = arith.constant 0.000000e+00 : f32
    %10 = vector.broadcast %cst_7 : f32 to vector<256x8xf32>
    %11 = arith.maximumf %9, %10 : vector<256x8xf32>
    %c0_8 = arith.constant 0 : index
    %c0_9 = arith.constant 0 : index
    %12 = vector.load %arg5[%c0_8, %c0_9] : memref<1x8xf32, #tpu.memory_space<vmem>>, vector<1x8xf32>
    %13 = vector.broadcast %12 : vector<1x8xf32> to vector<256x8xf32>
    %14 = arith.mulf %11, %13 : vector<256x8xf32>
    %c0_10 = arith.constant 0 : index
    %c0_11 = arith.constant 0 : index
    %15 = vector.load %arg6[%c0_10, %c0_11] : memref<1x8xf32, #tpu.memory_space<vmem>>, vector<1x8xf32>
    %16 = vector.broadcast %15 : vector<1x8xf32> to vector<256x8xf32>
    %17 = arith.addf %14, %16 : vector<256x8xf32>
    %cst_12 = arith.constant 0.000000e+00 : f32
    %18 = vector.broadcast %cst_12 : f32 to vector<256x8xf32>
    %19 = arith.maximumf %17, %18 : vector<256x8xf32>
    %c0_13 = arith.constant 0 : index
    %c0_14 = arith.constant 0 : index
    %20 = vector.load %arg10[%c0_13, %c0_14] : memref<1x8xf32, #tpu.memory_space<vmem>>, vector<1x8xf32>
    %cst_15 = arith.constant dense<0.000000e+00> : vector<8xf32>
    %21 = vector.multi_reduction <add>, %19, %cst_15 [0] : vector<256x8xf32> to vector<8xf32>
    %22 = vector.shape_cast %21 : vector<8xf32> to vector<1x8xf32>
    %23 = arith.addf %20, %22 : vector<1x8xf32>
    %c0_16 = arith.constant 0 : index
    %c0_17 = arith.constant 0 : index
    %24 = vector.load %arg10[%c0_16, %c0_17] : memref<1x8xf32, #tpu.memory_space<vmem>>, vector<1x8xf32>
    tpu.vector_store %arg10[%c0_16, %c0_17], %23 {strides = array<i32>} : memref<1x8xf32, #tpu.memory_space<vmem>>, vector<1x8xf32>,
    %c0_i32_18 = arith.constant 0 : i32
    %25 = arith.cmpi eq, %arg1, %c0_i32_18 : i32
    %26 = arith.extui %25 : i1 to i32
    %c0_i32_19 = arith.constant 0 : i32
    %27 = arith.cmpi ne, %26, %c0_i32_19 : i32
    scf.if %27 {
      %c0_20 = arith.constant 0 : index
      %c0_21 = arith.constant 0 : index
      %28 = vector.load %arg10[%c0_20, %c0_21] : memref<1x8xf32, #tpu.memory_space<vmem>>, vector<1x8xf32>
      %cst_22 = arith.constant 3.906250e-03 : f32
      %29 = vector.broadcast %cst_22 : f32 to vector<1x8xf32>
      %30 = arith.mulf %28, %29 : vector<1x8xf32>
      %c0_23 = arith.constant 0 : index
      %c0_24 = arith.constant 0 : index
      %31 = vector.load %arg7[%c0_23, %c0_24] : memref<8x10xf32, #tpu.memory_space<vmem>>, vector<8x10xf32>
      %cst_25 = arith.constant dense<0.000000e+00> : vector<1x10xf32>
      %32 = tpu.matmul %30, %31, %cst_25 {dimension_numbers = #tpu.dot_dimension_numbers<[1], [0], [0], [1], [0, 0, 1, 1], [], []>} : vector<1x8xf32>, vector<8x10xf32>, vector<1x10xf32> -> vector<1x10xf32>
      %c0_26 = arith.constant 0 : index
      %c0_27 = arith.constant 0 : index
      %33 = vector.load %arg8[%c0_26, %c0_27] : memref<1x10xf32, #tpu.memory_space<vmem>>, vector<1x10xf32>
      %34 = arith.addf %32, %33 : vector<1x10xf32>
      %cst_28 = arith.constant dense<0xFF800000> : vector<1xf32>
      %35 = vector.multi_reduction <maximumf>, %34, %cst_28 [1] : vector<1x10xf32> to vector<1xf32>
      %36 = vector.shape_cast %35 : vector<1xf32> to vector<1x1xf32>
      %37 = vector.broadcast %36 : vector<1x1xf32> to vector<1x10xf32>
      %38 = arith.subf %34, %37 : vector<1x10xf32>
      %39 = math.exp %38 : vector<1x10xf32>
      %cst_29 = arith.constant dense<0.000000e+00> : vector<1xf32>
      %40 = vector.multi_reduction <add>, %39, %cst_29 [1] : vector<1x10xf32> to vector<1xf32>
      %41 = vector.shape_cast %40 : vector<1xf32> to vector<1x1xf32>
      %42 = math.log %41 : vector<1x1xf32>
      %43 = vector.broadcast %42 : vector<1x1xf32> to vector<1x10xf32>
      %44 = arith.subf %38, %43 : vector<1x10xf32>
      %c0_30 = arith.constant 0 : index
      %c0_31 = arith.constant 0 : index
      %c0_32 = arith.constant 0 : index
      %45 = vector.load %arg9[%c0_30, %c0_31, %c0_32] : memref<1x1x10xf32, #tpu.memory_space<vmem>>, vector<1x1x10xf32>
      %46 = vector.shape_cast %45 : vector<1x1x10xf32> to vector<1x10xf32>
      %47 = vector.shape_cast %44 : vector<1x10xf32> to vector<1x1x10xf32>
      tpu.vector_store %arg9[%c0_30, %c0_31, %c0_32], %47 {strides = array<i32>} : memref<1x1x10xf32, #tpu.memory_space<vmem>>, vector<1x1x10xf32>,
    } else {
    }
    return
  }
  func.func @transform_0(%arg0: i32, %arg1: i32) -> (i32, i32, i32) {
    %c0_i32 = arith.constant 0 : i32
    %c0_i32_0 = arith.constant 0 : i32
    return %arg0, %arg1, %c0_i32 : i32, i32, i32
  }
  func.func @transform_1(%arg0: i32, %arg1: i32) -> (i32, i32) {
    %c0_i32 = arith.constant 0 : i32
    %c0_i32_0 = arith.constant 0 : i32
    %c0_i32_1 = arith.constant 0 : i32
    return %c0_i32, %c0_i32_0 : i32, i32
  }
  func.func @transform_2(%arg0: i32, %arg1: i32) -> (i32, i32) {
    %c0_i32 = arith.constant 0 : i32
    %c0_i32_0 = arith.constant 0 : i32
    %c0_i32_1 = arith.constant 0 : i32
    return %c0_i32, %c0_i32_0 : i32, i32
  }
  func.func @transform_3(%arg0: i32, %arg1: i32) -> (i32, i32) {
    %c0_i32 = arith.constant 0 : i32
    %c0_i32_0 = arith.constant 0 : i32
    %c0_i32_1 = arith.constant 0 : i32
    return %c0_i32, %c0_i32_0 : i32, i32
  }
  func.func @transform_4(%arg0: i32, %arg1: i32) -> (i32, i32) {
    %c0_i32 = arith.constant 0 : i32
    %c0_i32_0 = arith.constant 0 : i32
    %c0_i32_1 = arith.constant 0 : i32
    return %c0_i32, %c0_i32_0 : i32, i32
  }
  func.func @transform_5(%arg0: i32, %arg1: i32) -> (i32, i32) {
    %c0_i32 = arith.constant 0 : i32
    %c0_i32_0 = arith.constant 0 : i32
    %c0_i32_1 = arith.constant 0 : i32
    return %c0_i32, %c0_i32_0 : i32, i32
  }
  func.func @transform_6(%arg0: i32, %arg1: i32) -> (i32, i32) {
    %c0_i32 = arith.constant 0 : i32
    %c0_i32_0 = arith.constant 0 : i32
    %c0_i32_1 = arith.constant 0 : i32
    return %c0_i32, %c0_i32_0 : i32, i32
  }
  func.func @transform_7(%arg0: i32, %arg1: i32) -> (i32, i32, i32) {
    %c0_i32 = arith.constant 0 : i32
    %c0_i32_0 = arith.constant 0 : i32
    %c0_i32_1 = arith.constant 0 : i32
    return %arg0, %c0_i32, %c0_i32_0 : i32, i32, i32
  }
}

</mosaic_0001>

<bundles_post_ra>
// kernel: tpu_custom_call.1
= control target key start
LH: loop header
LB: loop body
LE: loop exit
PB: predicated region body
PF: predicated region fallthrough
CT: control target
= control target key end

     0   :  { %12 = vsyncpa [#allocation4], 0  ;;  %s1727_s0 = inlined_call_operand.vmem [shape: bf16[2,256,36], index: 0, kind: input, shape index: {}]   ;;  %s1728_s1 = inlined_call_operand.vmem [shape: bf16[36,8], index: 1, kind: input, shape index: {}]   ;;  %s1729_s2 = inlined_call_operand.vmem [shape: f32[1,8], index: 2, kind: input, shape index: {}]   ;;  %s1730_s3 = inlined_call_operand.vmem [shape: f32[1,8], index: 3, kind: input, shape index: {}]   ;;  %s1731_s4 = inlined_call_operand.vmem [shape: f32[1,8], index: 4, kind: input, shape index: {}]   ;;  %s1732_s5 = inlined_call_operand.vmem [shape: f32[8,10], index: 5, kind: input, shape index: {}]   ;;  %s1733_s6 = inlined_call_operand.vmem [shape: f32[1,10], index: 6, kind: input, shape index: {}]   ;;  %s1734_s7 = inlined_call_operand.hbm [shape: f32[2,1,10], index: 7, kind: output, shape index: {}]  }
   0x1   :  { %14 = vsyncpa [#allocation4 + $0x1], 0  ;;  %s1381_s24 = smov 0   ;;  %s1383_s25 = smov 0  }
   0x2   :  { %s1385_s26 = smov 0   ;;  %s1387_s27 = smov 0  }
   0x3   :  { %s1389_s28 = smov 0   ;;  %s1391_s29 = smov 0  }
   0x4 LB: > { %s1056_s30 = sadd.s32 4294967295, %s1336_s29   ;;  %s1057_s8 = sadd.s32 4294967294, %s1336_s29   ;;  %s1336_s29 = sphi %s1391_s29, %s20_s29   ;;  %s1332_s28 = sphi %s1389_s28, %s1741_s28   ;;  %s1328_s27 = sphi %s1387_s27, %s1740_s27   ;;  %s1324_s26 = sphi %s1385_s26, %s1739_s26   ;;  %s1320_s25 = sphi %s1383_s25, %s1738_s25   ;;  %s1316_s24 = sphi %s1381_s24, %s1737_s24  }
   0x5   : > { %s32_s9 = sadd.s32 1, %s1332_s28  ;;  %s193_s10 = sadd.s32 1, %s1324_s26 }
   0x6   : > { %p34_p0 = scmp.ge.s32.totalorder %s32_s9, 2  ;;  %p203_p1 = scmp.ne.s32.totalorder %s1324_s26, %s1320_s25 }
   0x7   : > { %p204_p2 = scmp.eq.s32.totalorder %s1056_s30, 1  ;;  %p209_p3 = scmp.ne.s32.totalorder %s1320_s25, %s1316_s24 }
   0x8   : > { %s1743_s9 = smov (%p34_p0, %s32_s9), 0  ;;  %p210_p5 = scmp.eq.s32.totalorder %s1057_s8, 1 }
   0x9   : > { %p1421_p4 = por %p204_p2, %p203_p1  ;;  %s190_s12 = ssub.s32 %s1332_s28, %s1743_s9 }
   0xa   : > { %p1060_p6 = scmp.ge.s32.totalorder %s1336_s29, 1  ;;  %p191_p7 = scmp.eq.s32.totalorder %s190_s12, 0 }
   0xb   : > { %p1428_p8 = por %p210_p5, %p209_p3  ;;  %p259_p9 = scmp.lt.s32.totalorder %s1336_s29, 3 }
   0xc   : > { %s1434_s14 = scalar_select %p191_p7, %s1324_s26, %s193_s10  }
   0xd   : > { %p260_p10 = pnand %p1060_p6, %p259_p9 }
   0xe   : > { %v1235_v0 = vld [vmem:[%s1728_s1] sm:$0xff] (!%p260_p10)   ;;  %v1236_v1 = vld [vmem:[%s1728_s1 + $0x8] sm:$0xff] (!%p260_p10)   ;;  %p295_p11 = scmp.lt.s32.totalorder (!%p260_p10), %s1328_s27, 1  ;;  %v1237_v2 = vld [vmem:[%s1728_s1 + $0x10] ss:$0 sps:$4 sm:$0x33] (!%p260_p10)  }
   0xf   : > { %263 = sbr.rel (%p260_p10) target bundleno = 884 (0x374), region = 48  ;;  %1127 = vmatprep.subr.bf16.mxu0 (!%p260_p10), %v1235_v0  ;;  %1170 = vmatprep.subr.bf16.mxu1 (!%p260_p10), %v1235_v0  ;;  %vm499_vm0 = vcmask (!%p260_p10), 1041408   ;;  %vm450_vm1 = vcmask (!%p260_p10), 293888   ;;  %vm309_vm2 = vcmask (!%p260_p10), 57344   ;;  %v1338_v20 = vmov (!%p260_p10), 0.0   ;;  %v885_v21 = vld [vmem:[%s1732_s5] sm:$0xff] (!%p260_p10) }
  0x10   : > { %1128 = vmatpush3.bf16.msra.mxu0 (!%p260_p10), %v1235_v0  ;;  %1173 = vmatpush3.bf16.msra.mxu1 (!%p260_p10), %v1235_v0  ;;  %v501_v4 = vsel (!%p260_p10), %vm499_vm0, %v1237_v2, 0  ;;  %310 = vst.msk [vmem:[#allocation2] sm:$0x1] (!%p260_p10), %vm309_vm2, %v1338_v20  ;;  %vm1339_vm3 = vmmov (!%p260_p10), 0   ;;  %v1491_v22 = vld [vmem:[%s1729_s2] ss:$0 sm:$0xff] (!%p260_p10) }
  0x11   : > { %1129 = vmatprep.subr.bf16.mxu0 (!%p260_p10), %v1236_v1  ;;  %1171 = vmatprep.subr.bf16.mxu1 (!%p260_p10), %v1236_v1  ;;  %v1497_v26 = vld [vmem:[%s1730_s3] ss:$0 sm:$0xff] (!%p260_p10)  ;;  %vm807_vm4 = vcmask (!%p260_p10), 64512   ;;  %vm960_vm5 = vcmask (!%p260_p10), 73728   ;;  %s292_s23 = sand.u32 (!%p260_p10), 1, %s1320_s25   ;;  %s1102_s30 = sshll.u32 (!%p260_p10), %s1328_s27, 4 }
  0x12   : > { %v1506_v35 = vld [vmem:[%s1731_s4] ss:$0 sm:$0xff] (!%p260_p10)  ;;  %s1679_s16 = scalar_lea.hbm (!%p260_p10), %s1734_s7, %s1102_s30  ;;  %s975_s17 = scalar_lea.sflag (!%p260_p10), [#allocation4], %s292_s23 }
  0x14   : > { %1130 = vmatpush3.bf16.msra.mxu0 (!%p260_p10), %v1236_v1  ;;  %1174 = vmatpush3.bf16.msra.mxu1 (!%p260_p10), %v1236_v1 }
  0x15   : > { %1176 = vmatprep.subr.msk.bf16.mxu0 (!%p260_p10), %vm499_vm0, %v1237_v2  ;;  %1177 = vmatprep.subr.msk.bf16.mxu1 (!%p260_p10), %vm499_vm0, %v1237_v2 }
  0x16   : > { %s296_s19 = scalar_select %p295_p11, %s1328_s27, 1 }
  0x17   : > { %s1340_s27 = smov [#allocation3]  }
  0x18   : > { %s1105_s22 = sshll.u32 %s296_s19, 7  ;;  %1132 = vmatpush3.bf16.msra.mxu0 %v501_v4  ;;  %1175 = vmatpush3.bf16.msra.mxu1 %v501_v4  ;;  %s1262_s19 = sshll.u32 %s1340_s27, 4  ;;  %s1263_s19 = int_to_ptr.vmem [resolvable:$false] %s1262_s19 }
  0x19   : > { %s1450_s8 = scalar_lea.vmem %s1727_s0, %s1105_s22  ;;  %1165 = vmatprep.subr.mxu1 %v1338_v20  ;;  %s1264_s20 = scalar_lea.vmem %s1263_s19, 32 }
  0x1a   : > { %v1238_v3 = vld [vmem:[%s1450_s8] sm:$0xff]   ;;  %v1239_v5 = vld [vmem:[%s1450_s8 + $0x8] sm:$0xff]   ;;  %v1240_v6 = vld [vmem:[%s1450_s8 + $0x10] sm:$0xff]  }
  0x1b   : > { %1133 = vmatprep.mubr.msk.bf16.mxu0 %vm450_vm1, %v1238_v3  ;;  %v1241_v7 = vld [vmem:[%s1450_s8 + $0x18] sm:$0xff]   ;;  %v1242_v8 = vld [vmem:[%s1450_s8 + $0x20] sm:$0xff]   ;;  %v1248_v9 = vld [vmem:[%s1450_s8 + $0x50] sm:$0xff]  }
  0x1c   : > { %1134 = vmatmul.mubr.msk.bf16.vlgmr.msra.gmra.mrb[0].mxu0 %vm450_vm1, %v1239_v5  ;;  %v1249_v10 = vld [vmem:[%s1450_s8 + $0x58] sm:$0xff]   ;;  %1153 = vmatprep.mubr.msk.bf16.mxu1 %vm450_vm1, %v1248_v9  ;;  %v1250_v11 = vld [vmem:[%s1450_s8 + $0x60] sm:$0xff]   ;;  %v1251_v12 = vld [vmem:[%s1450_s8 + $0x68] sm:$0xff]  }
  0x1d   : > { %1137 = vmatprep.mubr.msk.bf16.mxu0 %vm450_vm1, %v1240_v6  ;;  %1154 = vmatmul.mubr.msk.bf16.vlgmr.msra.gmra.mrb[0].mxu1 %vm450_vm1, %v1249_v10  ;;  %v1252_v13 = vld [vmem:[%s1450_s8 + $0x70] sm:$0xff]   ;;  %v1243_v14 = vld [vmem:[%s1450_s8 + $0x28] sm:$0xff]   ;;  %v1253_v16 = vld [vmem:[%s1450_s8 + $0x78] sm:$0xff]  }
  0x1e   : > { %1157 = vmatprep.mubr.msk.bf16.mxu1 %vm450_vm1, %v1250_v11  ;;  %v1244_v15 = vld [vmem:[%s1450_s8 + $0x30] sm:$0xff]   ;;  %v1245_v17 = vld [vmem:[%s1450_s8 + $0x38] sm:$0xff]   ;;  %v1246_v18 = vld [vmem:[%s1450_s8 + $0x40] sm:$0xff]   ;;  %1166 = vmatpush3.msra.mxu1 %v885_v21 }
  0x1f   : > { %v1247_v19 = vld [vmem:[%s1450_s8 + $0x48] sm:$0xff]   ;;  %s293_s8 = scalar_lea.vmem [#allocation3], %s292_s23 }
  0x20   : > { %s987_s10 = sshll.u32 %s293_s8, 4  ;;  %s1681_s10 = int_to_ptr.vmem [resolvable:$true] %s987_s10 }
  0x21   : > { %s1258_s18 = scalar_lea.vmem %s1681_s10, 16  ;;  %p1265_p1 = scmp.lt.s32.totalorder %s1681_s10, %s1263_s19 }
  0x22   : > { %p1259_p12 = scmp.ne.s32.totalorder %s1681_s10, %s1258_s18  ;;  %p1266_p2 = scmp.lt.s32.totalorder %s1264_s20, %s1258_s18 }
  0x24   : > { %1138 = vmatmul.mubr.msk.bf16.gmra.mrb[4].mxu0 %vm450_vm1, %v1241_v7  ;;  %p1260_p13 = pnand %p1259_p12, %p1421_p4  ;;  %p1267_p3 = por %p1266_p2, %p1265_p1 }
  0x25   : > { %1141 = vmatprep.mubr.msk.bf16.mxu0 %vm450_vm1, %v1242_v8  ;;  %1158 = vmatmul.mubr.msk.bf16.gmra.mrb[4].mxu1 %vm450_vm1, %v1251_v12 }
  0x26   : > { %1161 = vmatprep.mubr.msk.bf16.mxu1 %vm450_vm1, %v1252_v13  ;;  %p1261_p0 = pneg %p1260_p13 }
  0x28   : > { %p1268_p5 = pnand %p1267_p3, %p1261_p0 }
  0x2c   : > { %1142 = vmatmul.mubr.msk.bf16.gmra.mrb[8].mxu0 %vm450_vm1, %v1243_v14 }
  0x2d   : > { %1145 = vmatprep.mubr.msk.bf16.mxu0 %vm450_vm1, %v1244_v15  ;;  %1162 = vmatmul.mubr.msk.bf16.gmra.mrb[8].mxu1 %vm450_vm1, %v1253_v16 }
  0x2e   : > { %1167 = vmatprep.mubr.msk.f32.mxu1 %vm1339_vm3, %v1338_v20 }
  0x34   : > { %1146 = vmatmul.mubr.msk.bf16.gmra.mrb[12].mxu0 %vm450_vm1, %v1245_v17 }
  0x35   : > { %1149 = vmatprep.mubr.msk.bf16.mxu0 %vm450_vm1, %v1246_v18 }
  0x3c   : > { %1150 = vmatmul.mubr.msk.bf16.gmra.mrb[16].mxu0 %vm450_vm1, %v1247_v19 }
  0xef   : > { %v1135_v23 = vpop.f32.mrb[0].mxu0 }
  0xf0   : > { %v546_v24 = vadd.f32 %v1135_v23, %v1491_v22  ;;  %v537_v25 = vpop.f32.mrb[1].mxu0  ;;  %v1509_v39 = vpop.f32.mrb[0].mxu1 }
  0xf1   : > { %v538_v27 = vadd.f32 %v1491_v22, %v537_v25  ;;  %v1136_v28 = vpop.f32.mrb[2].mxu0  ;;  %v1512_v41 = vpop.f32.mrb[1].mxu1 }
  0xf2   : > { %v666_v29 = vmax.f32 %v546_v24, 0.0  ;;  %v549_v30 = vadd.f32 %v1136_v28, %v1491_v22  ;;  %v540_v31 = vpop.f32.mrb[3].mxu0  ;;  %v1517_v46 = vpop.f32.mrb[2].mxu1 }
  0xf3   : > { %v664_v32 = vmax.f32 %v538_v27, 0.0  ;;  %v541_v33 = vadd.f32 %v1491_v22, %v540_v31  ;;  %v1521_v50 = vpop.f32.mrb[3].mxu1 }
  0xf4   : > { %v705_v34 = vmul.f32 %v1497_v26, %v666_v29  ;;  %v667_v36 = vmax.f32 %v549_v30, 0.0 }
  0xf5   : > { %v703_v37 = vmul.f32 %v1497_v26, %v664_v32  ;;  %v665_v38 = vmax.f32 %v541_v33, 0.0 }
  0xf6   : > { %v706_v40 = vmul.f32 %v1497_v26, %v667_v36  ;;  %v744_v42 = vadd.f32 %v1506_v35, %v705_v34 }
  0xf7   : > { %v742_v43 = vadd.f32 %v1506_v35, %v703_v37  ;;  %v704_v44 = vmul.f32 %v1497_v26, %v665_v38  ;;  %v1139_v45 = vpop.f32.mrb[4].mxu0 }
  0xf8   : > { %v745_v47 = vadd.f32 %v1506_v35, %v706_v40  ;;  %v562_v48 = vadd.f32 %v1139_v45, %v1491_v22  ;;  %v553_v49 = vpop.f32.mrb[5].mxu0  ;;  %v776_v58 = vmax.f32 %v744_v42, 0.0  ;;  %v1531_v5 = vpop.f32.mrb[4].mxu1 }
  0xf9   : > { %v774_v51 = vmax.f32 %v742_v43, 0.0  ;;  %v743_v52 = vadd.f32 %v1506_v35, %v704_v44  ;;  %v554_v53 = vadd.f32 %v1491_v22, %v553_v49  ;;  %v1140_v54 = vpop.f32.mrb[6].mxu0  ;;  %v1535_v9 = vpop.f32.mrb[5].mxu1  ;;  %v618_v49 = vadd.f32 %v1491_v22, %v1512_v41 }
  0xfa   : > { %v670_v55 = vmax.f32 %v562_v48, 0.0  ;;  %v565_v56 = vadd.f32 %v1140_v54, %v1491_v22  ;;  %v556_v57 = vpop.f32.mrb[7].mxu0  ;;  %v777_v62 = vmax.f32 %v745_v47, 0.0  ;;  %v811_v10 = vsel %vm807_vm4, %v776_v58, 0.0  ;;  %v1540_v14 = vpop.f32.mrb[6].mxu1 }
  0xfb   : > { %v775_v59 = vmax.f32 %v743_v52, 0.0  ;;  %v668_v60 = vmax.f32 %v554_v53, 0.0  ;;  %v557_v61 = vadd.f32 %v1491_v22, %v556_v57  ;;  %v808_v1 = vsel %vm807_vm4, %v774_v51, 0.0  ;;  %v1544_v19 = vpop.f32.mrb[7].mxu1 }
  0xfc   : > { %v709_v63 = vmul.f32 %v1497_v26, %v670_v55  ;;  %v671_v0 = vmax.f32 %v565_v56, 0.0  ;;  %v813_v15 = vsel %vm807_vm4, %v777_v62, 0.0 }
  0xfd   : > { %v809_v2 = vsel %vm807_vm4, %v775_v59, 0.0  ;;  %v707_v3 = vmul.f32 %v1497_v26, %v668_v60  ;;  %v669_v4 = vmax.f32 %v557_v61, 0.0 }
  0xfe   : > { %v810_v6 = vadd.f32 %v809_v2, %v808_v1  ;;  %v748_v7 = vadd.f32 %v1506_v35, %v709_v63  ;;  %v710_v8 = vmul.f32 %v1497_v26, %v671_v0 }
  0xff   : > { %v746_v11 = vadd.f32 %v1506_v35, %v707_v3  ;;  %v708_v12 = vmul.f32 %v1497_v26, %v669_v4  ;;  %v1143_v13 = vpop.f32.mrb[8].mxu0 }
 0x100   : > { %v812_v16 = vadd.f32 %v811_v10, %v810_v6  ;;  %v578_v17 = vadd.f32 %v1143_v13, %v1491_v22  ;;  %v569_v18 = vpop.f32.mrb[9].mxu0  ;;  %v749_v21 = vadd.f32 %v1506_v35, %v710_v8  ;;  %v780_v27 = vmax.f32 %v748_v7, 0.0  ;;  %v1555_v45 = vpop.f32.mrb[8].mxu1 }
 0x101   : > { %v778_v20 = vmax.f32 %v746_v11, 0.0  ;;  %v747_v23 = vadd.f32 %v1506_v35, %v708_v12  ;;  %v570_v24 = vadd.f32 %v1491_v22, %v569_v18  ;;  %v1144_v25 = vpop.f32.mrb[10].mxu0  ;;  %v1559_v51 = vpop.f32.mrb[9].mxu1  ;;  %v684_v8 = vmax.f32 %v618_v49, 0.0 }
 0x102   : > { %v814_v28 = vadd.f32 %v813_v15, %v812_v16  ;;  %v674_v29 = vmax.f32 %v578_v17, 0.0  ;;  %v572_v30 = vpop.f32.mrb[11].mxu0  ;;  %v581_v34 = vadd.f32 %v1144_v25, %v1491_v22  ;;  %v781_v40 = vmax.f32 %v749_v21, 0.0  ;;  %v1565_v57 = vpop.f32.mrb[10].mxu1 }
 0x103   : > { %v815_v31 = vsel %vm807_vm4, %v778_v20, 0.0  ;;  %v779_v32 = vmax.f32 %v747_v23, 0.0  ;;  %v672_v33 = vmax.f32 %v570_v24, 0.0  ;;  %v573_v38 = vadd.f32 %v1491_v22, %v572_v30  ;;  %v1569_v41 = vpop.f32.mrb[11].mxu1 }
 0x104   : > { %v816_v36 = vadd.f32 %v815_v31, %v814_v28  ;;  %v713_v37 = vmul.f32 %v1497_v26, %v674_v29  ;;  %v675_v44 = vmax.f32 %v581_v34, 0.0  ;;  %v819_v52 = vsel %vm807_vm4, %v780_v27, 0.0 }
 0x105   : > { %v817_v42 = vsel %vm807_vm4, %v779_v32, 0.0  ;;  %v711_v43 = vmul.f32 %v1497_v26, %v672_v33  ;;  %v673_v48 = vmax.f32 %v573_v38, 0.0  ;;  %v821_v62 = vsel %vm807_vm4, %v781_v40, 0.0 }
 0x106   : > { %v818_v47 = vadd.f32 %v817_v42, %v816_v36  ;;  %v752_v53 = vadd.f32 %v1506_v35, %v713_v37  ;;  %v714_v55 = vmul.f32 %v1497_v26, %v675_v44  ;;  %v626_v24 = vadd.f32 %v1509_v39, %v1491_v22 }
 0x107   : > { %v750_v54 = vadd.f32 %v1506_v35, %v711_v43  ;;  %v1147_v56 = vpop.f32.mrb[12].mxu0  ;;  %v712_v59 = vmul.f32 %v1497_v26, %v673_v48  ;;  %v723_v28 = vmul.f32 %v1497_v26, %v684_v8  ;;  %v629_v29 = vadd.f32 %v1517_v46, %v1491_v22 }
 0x108   : > { %v820_v58 = vadd.f32 %v819_v52, %v818_v47  ;;  %v594_v60 = vadd.f32 %v1147_v56, %v1491_v22  ;;  %v585_v61 = vpop.f32.mrb[13].mxu0  ;;  %v753_v0 = vadd.f32 %v1506_v35, %v714_v55  ;;  %v784_v10 = vmax.f32 %v752_v53, 0.0 }
 0x109   : > { %v782_v63 = vmax.f32 %v750_v54, 0.0  ;;  %v586_v1 = vadd.f32 %v1491_v22, %v585_v61  ;;  %v1148_v2 = vpop.f32.mrb[14].mxu0  ;;  %v751_v4 = vadd.f32 %v1506_v35, %v712_v59  ;;  %v621_v40 = vadd.f32 %v1491_v22, %v1521_v50 }
 0x10a   : > { %v822_v3 = vadd.f32 %v821_v62, %v820_v58  ;;  %v678_v6 = vmax.f32 %v594_v60, 0.0  ;;  %v588_v7 = vpop.f32.mrb[15].mxu0  ;;  %v597_v13 = vadd.f32 %v1148_v2, %v1491_v22  ;;  %v785_v20 = vmax.f32 %v753_v0, 0.0 }
 0x10b   : > { %v823_v11 = vsel %vm807_vm4, %v782_v63, 0.0  ;;  %v676_v12 = vmax.f32 %v586_v1, 0.0  ;;  %v783_v16 = vmax.f32 %v751_v4, 0.0  ;;  %v589_v18 = vadd.f32 %v1491_v22, %v588_v7 }
 0x10c   : > { %v824_v15 = vadd.f32 %v823_v11, %v822_v3  ;;  %v717_v17 = vmul.f32 %v1497_v26, %v678_v6  ;;  %v679_v23 = vmax.f32 %v597_v13, 0.0  ;;  %v827_v36 = vsel %vm807_vm4, %v784_v10, 0.0 }
 0x10d   : > { %v715_v21 = vmul.f32 %v1497_v26, %v676_v12  ;;  %v825_v25 = vsel %vm807_vm4, %v783_v16, 0.0  ;;  %v677_v27 = vmax.f32 %v589_v18, 0.0  ;;  %v829_v46 = vsel %vm807_vm4, %v785_v20, 0.0 }
 0x10e   : > { %v826_v30 = vadd.f32 %v825_v25, %v824_v15  ;;  %v756_v31 = vadd.f32 %v1506_v35, %v717_v17  ;;  %v718_v33 = vmul.f32 %v1497_v26, %v679_v23  ;;  %v686_v1 = vmax.f32 %v626_v24, 0.0 }
 0x10f   : > { %v754_v32 = vadd.f32 %v1506_v35, %v715_v21  ;;  %v1151_v34 = vpop.f32.mrb[16].mxu0  ;;  %v716_v39 = vmul.f32 %v1497_v26, %v677_v27  ;;  %v685_v2 = vmax.f32 %v621_v40, 0.0  ;;  %v762_v11 = vadd.f32 %v1506_v35, %v723_v28 }
 0x110   : > { %v610_v37 = vadd.f32 %v1151_v34, %v1491_v22  ;;  %v601_v38 = vpop.f32.mrb[17].mxu0  ;;  %v828_v42 = vadd.f32 %v827_v36, %v826_v30  ;;  %v757_v48 = vadd.f32 %v1506_v35, %v718_v33  ;;  %v788_v55 = vmax.f32 %v756_v31, 0.0 }
 0x111   : > { %v786_v43 = vmax.f32 %v754_v32, 0.0  ;;  %v602_v44 = vadd.f32 %v1491_v22, %v601_v38  ;;  %v1152_v47 = vpop.f32.mrb[18].mxu0  ;;  %v755_v49 = vadd.f32 %v1506_v35, %v716_v39  ;;  %v687_v16 = vmax.f32 %v629_v29, 0.0 }
 0x112   : > { %v682_v52 = vmax.f32 %v610_v37, 0.0  ;;  %v613_v53 = vadd.f32 %v1152_v47, %v1491_v22  ;;  %v604_v54 = vpop.f32.mrb[19].mxu0  ;;  %v830_v56 = vadd.f32 %v829_v46, %v828_v42  ;;  %v789_v3 = vmax.f32 %v757_v48, 0.0 }
 0x113   : > { %v831_v58 = vsel %vm807_vm4, %v786_v43, 0.0  ;;  %v680_v50 = vmax.f32 %v602_v44, 0.0  ;;  %v787_v59 = vmax.f32 %v755_v49, 0.0  ;;  %v605_v62 = vadd.f32 %v1491_v22, %v604_v54 }
 0x114   : > { %v721_v60 = vmul.f32 %v1497_v26, %v682_v52  ;;  %v683_v61 = vmax.f32 %v613_v53, 0.0  ;;  %v832_v63 = vadd.f32 %v831_v58, %v830_v56  ;;  %v835_v12 = vsel %vm807_vm4, %v788_v55, 0.0 }
 0x115   : > { %v719_v0 = vmul.f32 %v1497_v26, %v680_v50  ;;  %v833_v4 = vsel %vm807_vm4, %v787_v59, 0.0  ;;  %v681_v7 = vmax.f32 %v605_v62, 0.0  ;;  %v724_v20 = vmul.f32 %v1497_v26, %v685_v2 }
 0x116   : > { %v722_v6 = vmul.f32 %v1497_v26, %v683_v61  ;;  %v834_v8 = vadd.f32 %v833_v4, %v832_v63  ;;  %v760_v13 = vadd.f32 %v1506_v35, %v721_v60  ;;  %v634_v21 = vadd.f32 %v1491_v22, %v1535_v9 }
 0x117   : > { %v758_v10 = vadd.f32 %v1506_v35, %v719_v0  ;;  %v720_v15 = vmul.f32 %v1497_v26, %v681_v7  ;;  %v837_v23 = vsel %vm807_vm4, %v789_v3, 0.0  ;;  %v725_v27 = vmul.f32 %v1497_v26, %v686_v1 }
 0x118   : > { %v836_v17 = vadd.f32 %v835_v12, %v834_v8  ;;  %v761_v24 = vadd.f32 %v1506_v35, %v722_v6  ;;  %v794_v31 = vmax.f32 %v762_v11, 0.0  ;;  %v688_v29 = vmax.f32 %v634_v21, 0.0 }
 0x119   : > { %v790_v18 = vmax.f32 %v758_v10, 0.0  ;;  %v759_v25 = vadd.f32 %v1506_v35, %v720_v15  ;;  %v792_v32 = vmax.f32 %v760_v13, 0.0  ;;  %v726_v34 = vmul.f32 %v1497_v26, %v687_v16 }
 0x11a   : > { %v838_v28 = vadd.f32 %v837_v23, %v836_v17  ;;  %v642_v9 = vadd.f32 %v1531_v5, %v1491_v22  ;;  %v763_v39 = vadd.f32 %v1506_v35, %v724_v20  ;;  %v645_v37 = vadd.f32 %v1540_v14, %v1491_v22 }
 0x11b   : > { %v839_v30 = vsel %vm807_vm4, %v790_v18, 0.0  ;;  %v791_v33 = vmax.f32 %v759_v25, 0.0  ;;  %v637_v38 = vadd.f32 %v1491_v22, %v1544_v19  ;;  %v793_v40 = vmax.f32 %v761_v24, 0.0 }
 0x11c   : > { %v840_v36 = vadd.f32 %v839_v30, %v838_v28  ;;  %v727_v42 = vmul.f32 %v1497_v26, %v688_v29  ;;  %v650_v43 = vadd.f32 %v1491_v22, %v1559_v51  ;;  %v764_v5 = vadd.f32 %v1506_v35, %v725_v27 }
 0x11d   : > { %v841_v46 = vsel %vm807_vm4, %v791_v33, 0.0  ;;  %v689_v47 = vmax.f32 %v637_v38, 0.0  ;;  %v843_v48 = vsel %vm807_vm4, %v792_v32, 0.0  ;;  %v765_v49 = vadd.f32 %v1506_v35, %v726_v34 }
 0x11e   : > { %v842_v44 = vadd.f32 %v841_v46, %v840_v36  ;;  %v690_v14 = vmax.f32 %v642_v9, 0.0  ;;  %v847_v19 = vsel %vm807_vm4, %v794_v31, 0.0  ;;  %v795_v53 = vmax.f32 %v763_v39, 0.0 }
 0x11f   : > { %v691_v54 = vmax.f32 %v645_v37, 0.0  ;;  %v845_v55 = vsel %vm807_vm4, %v793_v40, 0.0  ;;  %v766_v56 = vadd.f32 %v1506_v35, %v727_v42  ;;  %v728_v51 = vmul.f32 %v1497_v26, %v689_v47 }
 0x120   : > { %v844_v52 = vadd.f32 %v843_v48, %v842_v44  ;;  %v692_v58 = vmax.f32 %v650_v43, 0.0  ;;  %v796_v50 = vmax.f32 %v764_v5, 0.0  ;;  %v797_v60 = vmax.f32 %v765_v49, 0.0 }
 0x121   : > { %v729_v61 = vmul.f32 %v1497_v26, %v690_v14  ;;  %v658_v62 = vadd.f32 %v1555_v45, %v1491_v22  ;;  %v653_v63 = vadd.f32 %v1491_v22, %v1569_v41  ;;  %v849_v1 = vsel %vm807_vm4, %v795_v53, 0.0 }
 0x122   : > { %v846_v59 = vadd.f32 %v845_v55, %v844_v52  ;;  %v730_v2 = vmul.f32 %v1497_v26, %v691_v54  ;;  %v661_v3 = vadd.f32 %v1565_v57, %v1491_v22  ;;  %v798_v4 = vmax.f32 %v766_v56, 0.0 }
 0x123   : > { %v767_v6 = vadd.f32 %v1506_v35, %v728_v51  ;;  %v731_v7 = vmul.f32 %v1497_v26, %v692_v58  ;;  %v693_v8 = vmax.f32 %v653_v63, 0.0  ;;  %v851_v45 = vsel %vm807_vm4, %v796_v50, 0.0  ;;  %v886_v58 = vld [vmem:[%s1733_s6] sm:$0x1] }
 0x124   : > { %v848_v0 = vadd.f32 %v847_v19, %v846_v59  ;;  %v768_v11 = vadd.f32 %v1506_v35, %v729_v61  ;;  %v694_v41 = vmax.f32 %v658_v62, 0.0  ;;  %v853_v12 = vsel %vm807_vm4, %v797_v60, 0.0 }
 0x125   : > { %v769_v15 = vadd.f32 %v1506_v35, %v730_v2  ;;  %v695_v16 = vmax.f32 %v661_v3, 0.0  ;;  %v855_v22 = vsel %vm807_vm4, %v798_v4, 0.0  ;;  %v799_v57 = vmax.f32 %v767_v6, 0.0 }
 0x126   : > { %v850_v10 = vadd.f32 %v849_v1, %v848_v0  ;;  %v770_v17 = vadd.f32 %v1506_v35, %v731_v7  ;;  %v732_v18 = vmul.f32 %v1497_v26, %v693_v8  ;;  %v800_v21 = vmax.f32 %v768_v11, 0.0 }
 0x127   : > { %v733_v23 = vmul.f32 %v1497_v26, %v694_v41  ;;  %v801_v25 = vmax.f32 %v769_v15, 0.0  ;;  %v857_v27 = vsel %vm807_vm4, %v799_v57, 0.0  ;;  %v734_v30 = vmul.f32 %v1497_v26, %v695_v16 }
 0x128   : > { %v852_v13 = vadd.f32 %v851_v45, %v850_v10  ;;  %v802_v28 = vmax.f32 %v770_v17, 0.0  ;;  %v771_v31 = vadd.f32 %v1506_v35, %v732_v18  ;;  %v859_v32 = vsel %vm807_vm4, %v800_v21, 0.0 }
 0x129   : > { %v772_v33 = vadd.f32 %v1506_v35, %v733_v23  ;;  %v861_v9 = vsel %vm807_vm4, %v801_v25, 0.0  ;;  %v773_v39 = vadd.f32 %v1506_v35, %v734_v30  ;;  %v806_v35 = vld [vmem:[#allocation2] sm:$0x1] }
 0x12a   : > { %v854_v20 = vadd.f32 %v853_v12, %v852_v13  ;;  %v863_v36 = vsel %vm807_vm4, %v802_v28, 0.0  ;;  %v803_v37 = vmax.f32 %v771_v31, 0.0 }
 0x12b   : > { %v804_v40 = vmax.f32 %v772_v33, 0.0  ;;  %v805_v42 = vmax.f32 %v773_v39, 0.0 }
 0x12c   : > { %v856_v24 = vadd.f32 %v855_v22, %v854_v20  ;;  %v865_v26 = vsel %vm807_vm4, %v803_v37, 0.0 }
 0x12d   : > { %v867_v44 = vsel %vm807_vm4, %v804_v40, 0.0  ;;  %v869_v47 = vsel %vm807_vm4, %v805_v42, 0.0 }
 0x12e   : > { %v858_v29 = vadd.f32 %v857_v27, %v856_v24 }
 0x130   : > { %v860_v34 = vadd.f32 %v859_v32, %v858_v29 }
 0x132   : > { %v862_v38 = vadd.f32 %v861_v9, %v860_v34 }
 0x134   : > { %v864_v46 = vadd.f32 %v863_v36, %v862_v38 }
 0x136   : > { %v866_v43 = vadd.f32 %v865_v26, %v864_v46 }
 0x138   : > { %v868_v5 = vadd.f32 %v867_v44, %v866_v43 }
 0x13a   : > { %v870_v48 = vadd.f32 %v869_v47, %v868_v5 }
 0x13c   : > { %v871_v49 = vrot.slane %v870_v48, 4 }
 0x13e   : > { %v872_v14 = vadd.f32 %v871_v49, %v870_v48 }
 0x140   : > { %v873_v52 = vrot.slane %v872_v14, 2 }
 0x142   : > { %v874_v19 = vadd.f32 %v873_v52, %v872_v14 }
 0x144   : > { %v875_v53 = vrot.slane %v874_v19, 1 }
 0x146   : > { %v876_v54 = vadd.f32 %v875_v53, %v874_v19 }
 0x148   : > { %v877_v55 = vadd.f32 %v876_v54, %v806_v35 }
 0x14a   : > { %879 = vst.msk [vmem:[#allocation2] sm:$0x1] %vm309_vm2, %v877_v55 }
 0x151   : > { %v883_v56 = vld [vmem:[#allocation2] sm:$0x1] }
 0x152   : > { %v884_v51 = vmul.f32 0.00390625, %v883_v56 }
 0x154   : > { %1168 = vmatmul.mubr.msk.f32.vlgmr.msra.gmra.mrb[12].mxu1 %vm807_vm4, %v884_v51 }
 0x227   : > { %v956_v50 = vpop.f32.mrb[12].mxu1 }
 0x228   : > { %v957_v59 = vadd.f32 %v956_v50, %v886_v58  ;;  %v1169_v60 = vpop.f32.mrb[13].mxu1 }
 0x22a   : > { %v961_v61 = vsel %vm960_vm5, %v957_v59, -inf }
 0x22b   : > { %962 = vmax.xlane.f32.xlu0 %v961_v61 }
 0x2b8   : > { %v963_v62 = vpop.xlane.xlu0 %962 }
 0x2b9   : > { %v964_v63 = vsub.f32 %v957_v59, %v963_v62 }
 0x2bb   : > { %v965_v0 = vmul.f32 1.442695, %v964_v63 }
 0x2bd   : > { %1254 = vpow2.f32 %v965_v0 }
 0x2c7   : > { %v1255_v1 = vpop.eup %1254 }
 0x2c8   : > { %v967_v2 = vsel %vm960_vm5, %v1255_v1, 0.0 }
 0x2c9   : > { %968 = vadd.xlane.f32.xlu0 %v967_v2 }
 0x356   : > { %v969_v3 = vpop.xlane.xlu0 %968 }
 0x357   : > { %1256 = vlog2.f32 %v969_v3 }
 0x361   : > { %v1257_v4 = vpop.eup %1256 }
 0x362   : > { %v971_v6 = vmul.f32 0.6931472, %v1257_v4 }
 0x364   : > { %v972_v7 = vsub.f32 %v964_v63, %v971_v6 }
 0x366   : > { %973 = vst.msk [vmem:[%s293_s8] sm:$0x1] %vm960_vm5, %v972_v7 }
 0x367   : > { %1271 = shalt.err (!%p1268_p5)
}
 0x368   : > { %s1272_s21 = scalar_lea.hbm %s1679_s16, 16  ;;  %s1276_s30 = scalar_lea.hbm %s1734_s7, 32 }
 0x369   : > { %p1273_p6 = scmp.ne.s32.totalorder %s1679_s16, %s1272_s21  ;;  %p1277_p10 = scmp.lt.u32.totalorder %s1679_s16, %s1734_s7 }
 0x36a   : > { %p1278_p11 = scmp.lt.u32.totalorder %s1276_s30, %s1272_s21  ;;  %p1280_p13 = scmp.lt.u32.totalorder %s1272_s21, %s1679_s16 }
 0x36b   : > { %p1274_p7 = pnand %p1273_p6, %p1421_p4 }
 0x36c   : > { %p1279_p12 = por %p1278_p11, %p1277_p10 }
 0x36d   : > { %p1275_p9 = pneg %p1274_p7 }
 0x36e   : > { %p1281_p0 = por %p1280_p13, %p1279_p12 }
 0x370   : > { %p1282_p1 = pnand %p1281_p0, %p1275_p9 }
 0x372   : > { %1285 = shalt.err (!%p1282_p1)
}
 0x373   : > { %1178 = dma.vmem_to_hbm [thread:$0]  (%p1421_p4), %s1681_s10, 16, %s1679_s16, %s975_s17  }
 0x374 PF: > { %p1184_p2 = scmp.ge.s32.totalorder %s1336_s29, 2  ;;  %s999_s15 = sand.u32 1, %s1316_s24  }
 0x375   : > { %s1000_s18 = scalar_lea.sflag [#allocation4], %s999_s15 }
 0x376   : > { %p1181_p3 = pnand %p1184_p2, %p1428_p8 }
 0x378   : > { %1311 = dma.done.wait (!%p1181_p3), %s1000_s18, 16  }
 0x379   : > { %1313 = vsyncadd (!%p1181_p3), %s1000_s18, 4294967280  ;;  %s20_s29 = sadd.s32 1, %s1336_s29   ;;  %s1737_s24 = smov %s1320_s25 }
 0x37a   : > { %p17_p5 = scmp.ge.s32.totalorder %s20_s29, 4   ;;  %s1738_s25 = smov %s1324_s26 }
 0x37b   : > { %s1739_s26 = smov %s1434_s14  ;;  %s1740_s27 = smov %s1332_s28 }
 0x37c   : > { %s1741_s28 = smov %s1743_s9  ;;  %19 = sbr.rel (!%p17_p5) target bundleno = 4 (0x4), region = 91 }
 0x383   :  { %1004 = vsyncpa [#allocation4], 1 }
 0x384   :  { %1006 = vsyncpa [#allocation4 + $0x1], 1 }

</bundles_post_ra>
